<compile_context>
chip_gen: v6e
topology: v6e:2x2x1
jax: 0.10.0
libtpu: 0.0.40
codegen_flags: <defaults>
</compile_context>

<pallas_src>
import functools

import jax
import jax.numpy as jnp
from jax.experimental import pallas as pl
from jax.experimental.pallas import tpu as pltpu

_LANE = 128
_SUBLANE = 8


def _round_up(n: int, m: int) -> int:
    return ((n + m - 1) // m) * m


def _leaky_relu(x, negative_slope=0.01):
    # matches torch.nn.functional.leaky_relu default slope
    return jnp.where(x > 0, x, negative_slope * x)


def _make_kernel(hidden_layers: int, use: int, operand_dtype):
    """Fused MLP forward for one (policy, batch-tile) grid step."""

    def kernel(*refs):
        if hidden_layers == 2:
            x_ref, w1_ref, b1_ref, w2_ref, b2_ref, wo_ref, bo_ref, out_ref = refs
        else:
            x_ref, w1_ref, b1_ref, wo_ref, bo_ref, out_ref = refs
            w2_ref = b2_ref = None

        x = x_ref[...]                                   # (TB, L) f32, raw obs
        if use < x.shape[-1]:                            # obs longer -> truncate
            x = x[:, :use]
        k1 = w1_ref.shape[0]                             # == input_size (natural K)
        if use < k1:                                     # obs shorter -> zero-pad in vregs
            x = jnp.concatenate(
                [x, jnp.zeros((x.shape[0], k1 - use), x.dtype)], axis=-1)
        xk = x.astype(operand_dtype)

        h = jnp.dot(xk, w1_ref[...], preferred_element_type=jnp.float32)
        h = _leaky_relu(h + b1_ref[...])
        if hidden_layers == 2:
            h = jnp.dot(h.astype(operand_dtype), w2_ref[...],
                        preferred_element_type=jnp.float32)
            h = _leaky_relu(h + b2_ref[...])
        o = jnp.dot(h.astype(operand_dtype), wo_ref[...],
                    preferred_element_type=jnp.float32)
        o = o + bo_ref[...]
        # exact sigmoid (exp on EUP, one f32 divide) -> no approx-reciprocal drift
        out_ref[...] = (1.0 / (1.0 + jnp.exp(-o))).astype(out_ref.dtype)

    return kernel


class MLPPolicyPallas:
    """JAX/Pallas re-implementation of MLP_Policy (inference only).

    pop_size > 1 evaluates a whole CCEA population in a single pallas_call.
    """

    def __init__(self, input_size: int, hidden_layers: int, hidden_size: int,
                 output_size: int, key: jax.Array, pop_size: int = 1,
                 weight_dtype=jnp.bfloat16, out_dtype=jnp.float32):
        assert hidden_layers in (1, 2)
        self.input_size = input_size
        self.hidden_layers = hidden_layers
        self.hidden_size = hidden_size
        self.output_size = output_size
        self.pop_size = pop_size
        self.weight_dtype = weight_dtype
        self.out_dtype = out_dtype

        # Lane-dense (N) dims only; K dims stay natural (review item 2).
        self.h_pad = _round_up(hidden_size, _LANE)
        self.o_pad = _round_up(output_size, _LANE)

        # nn.Linear-style init U[-1/sqrt(fan_in), +bound], stored transposed
        # (in, out), zero-padded only along the output/lane dims.
        def init_linear(k, fan_in, fan_out, fan_in_store, fan_out_store):
            kw, kb = jax.random.split(k)
            bound = 1.0 / float(fan_in) ** 0.5
            w = jax.random.uniform(kw, (pop_size, fan_in, fan_out),
                                   jnp.float32, -bound, bound)
            b = jax.random.uniform(kb, (pop_size, fan_out),
                                   jnp.float32, -bound, bound)
            w_p = jnp.zeros((pop_size, fan_in_store, fan_out_store), weight_dtype)
            w_p = w_p.at[:, :fan_in, :fan_out].set(w.astype(weight_dtype))
            b_p = jnp.zeros((pop_size, 1, fan_out_store), jnp.float32)
            b_p = b_p.at[:, 0, :fan_out].set(b)
            return w_p, b_p

        keys = jax.random.split(key, 3)
        self.size_per_layer = []
        self.w1, self.b1 = init_linear(keys[0], input_size, hidden_size,
                                       input_size, self.h_pad)
        self.size_per_layer.append(input_size * hidden_size + hidden_size)
        params = (self.w1, self.b1)
        if hidden_layers == 2:
            self.w2, self.b2 = init_linear(keys[1], hidden_size, hidden_size,
                                           self.h_pad, self.h_pad)
            self.size_per_layer.append(hidden_size * hidden_size + hidden_size)
            params = params + (self.w2, self.b2)
        self.wo, self.bo = init_linear(keys[2], hidden_size, output_size,
                                       self.h_pad, self.o_pad)
        self.size_per_layer.append(hidden_size * output_size + output_size)
        self.params = params + (self.wo, self.bo)

        self._forward_jit = jax.jit(self._forward_impl)

    # ------------------------------------------------------------------ utils
    def _normalize(self, x):
        """Normalize caller input to (P, B, L) float32."""
        x = jnp.asarray(x, jnp.float32)
        if self.pop_size == 1:
            if x.ndim == 1:
                return x[None, None, :]        # single obs, like torch unsqueeze(0)
            if x.ndim == 2:
                return x[None]                 # (B, L) batch
            return x
        if x.ndim == 2:
            return x[:, None, :]               # (P, L): one obs per policy
        return x                               # (P, B, L)

    @staticmethod
    def _pick_tile_b(B: int, P: int) -> int:
        """Batch-tile rows: big tiles, but >=2 grid steps when P == 1 (v7x)."""
        if B <= _SUBLANE:
            return B                           # one full block (== array dim, legal)
        target = B if P > 1 else max(_SUBLANE, (B + 1) // 2)
        tile = min(512, _round_up(target, _SUBLANE))
        tile = min(tile, (B // _SUBLANE) * _SUBLANE)   # 8-aligned and <= B
        return max(tile, _SUBLANE)

    # ------------------------------------------------ one fused pallas_call
    def _forward_impl(self, xs, *params):
        P, B, L = xs.shape
        use = min(L, self.input_size)          # F.pad with negative pad == truncate
        tile_b = self._pick_tile_b(B, P)
        nbt = pl.cdiv(B, tile_b)
        grid = (P, nbt)

        kernel = _make_kernel(self.hidden_layers, use, self.weight_dtype)

        # Raw obs streamed per (policy, batch tile); weights/biases resident per
        # policy (index depends only on p, so they are fetched once per policy).
        in_specs = [pl.BlockSpec((None, tile_b, L), lambda p, i: (p, i, 0))]
        in_specs += [pl.BlockSpec((None,) + w.shape[1:], lambda p, i: (p, 0, 0))
                     for w in params]
        out_spec = pl.BlockSpec((None, tile_b, self.o_pad), lambda p, i: (p, i, 0))

        # Advisory cost estimate (exp + divide both counted as transcendentals).
        rows = nbt * tile_b
        flops = 2 * P * rows * (self.input_size * self.h_pad
                                + self.h_pad * self.o_pad)
        if self.hidden_layers == 2:
            flops += 2 * P * rows * self.h_pad * self.h_pad
        param_bytes = sum(int(w.size) * w.dtype.itemsize for w in params)
        out_itemsize = jnp.dtype(self.out_dtype).itemsize
        bytes_accessed = (param_bytes + int(xs.size) * xs.dtype.itemsize
                          + P * B * self.o_pad * out_itemsize)
        cost = pl.CostEstimate(flops=int(flops),
                               transcendentals=int(2 * P * rows * self.o_pad),
                               bytes_accessed=int(bytes_accessed))

        # Both grid axes are independent -> let megacore shard either one.
        cp_kwargs = dict(dimension_semantics=("parallel", "parallel"))
        # VMEM guard (only if the MLP ever grows large): cap derived from the
        # actual chip (v7x has 64 MiB physical per TC), never a hardcoded 128 MiB.
        per_policy_param_bytes = param_bytes // P
        tile_bytes = tile_b * (L * xs.dtype.itemsize + self.o_pad * out_itemsize)
        vmem_needed = 2 * (per_policy_param_bytes + tile_bytes)
        if vmem_needed > 16 * 1024 * 1024:
            try:
                phys = int(pltpu.get_tpu_info().vmem_capacity_bytes)
            except Exception:
                phys = 64 * 1024 * 1024
            cp_kwargs["vmem_limit_bytes"] = min(int(1.25 * vmem_needed),
                                                (phys * 3) // 4)

        out = pl.pallas_call(
            kernel,
            out_shape=jax.ShapeDtypeStruct((P, B, self.o_pad), self.out_dtype),
            grid=grid,
            in_specs=in_specs,
            out_specs=out_spec,
            compiler_params=pltpu.CompilerParams(**cp_kwargs),
            cost_estimate=cost,
        )(xs, *params)

        return out[..., : self.output_size]

    def __call__(self, x):
        xs = self._normalize(x)
        out = self._forward_jit(xs, *self.params)
        return out[0] if self.pop_size == 1 else out


# --------------------------------------------------------------------------
def _reference_forward(policy: MLPPolicyPallas, x):
    """Pure-JAX reference mirroring the kernel's dtype handling."""
    xs = policy._normalize(x)                                   # (P, B, L)
    P, B, L = xs.shape
    use = min(L, policy.input_size)
    dt = policy.weight_dtype
    xk = jnp.zeros((P, B, policy.input_size), jnp.float32)
    xk = xk.at[..., :use].set(xs[..., :use])
    xk = xk.astype(dt).astype(jnp.float32)

    w1 = policy.w1.astype(jnp.float32)
    h = _leaky_relu(jnp.einsum('pbk,pkh->pbh', xk, w1) + policy.b1)
    if policy.hidden_layers == 2:
        w2 = policy.w2.astype(jnp.float32)
        h = _leaky_relu(jnp.einsum('pbk,pkh->pbh',
                                   h.astype(dt).astype(jnp.float32), w2)
                        + policy.b2)
    wo = policy.wo.astype(jnp.float32)
    o = jnp.einsum('pbk,pko->pbo', h.astype(dt).astype(jnp.float32), wo) + policy.bo
    out = jax.nn.sigmoid(o)[..., : policy.output_size].astype(policy.out_dtype)
    return out[0] if policy.pop_size == 1 else out


if __name__ == "__main__":
    key = jax.random.PRNGKey(0)
    k_param, k_x, k_b, k_p1, k_pop, k_xp = jax.random.split(key, 6)

    input_size, hidden_layers, hidden_size, output_size = 32, 2, 32, 8

    # Single policy, single short observation (zero-pad path; same call pattern
    # as the PyTorch module's forward, which returns shape (1, output_size)).
    policy = MLPPolicyPallas(input_size, hidden_layers, hidden_size, output_size,
                             key=k_param)
    x = jax.random.normal(k_x, (20,), dtype=jnp.float32)
    out = jax.block_until_ready(policy(x))
    assert out.shape == (1, output_size), out.shape
    ref = _reference_forward(policy, x)
    assert jnp.allclose(out, ref, atol=2e-3, rtol=2e-3)

    # Batched rollout path (grid gets >= 2 batch tiles).
    B = 64
    xb = jax.random.normal(k_b, (B, 20), dtype=jnp.float32)
    outb = jax.block_until_ready(policy(xb))
    assert outb.shape == (B, output_size), outb.shape
    refb = jnp.asarray(_reference_forward(policy, xb))
    assert jnp.allclose(outb, refb, atol=2e-3, rtol=2e-3)

    # 1-hidden-layer branch + observation longer than input_size (truncation).
    policy1 = MLPPolicyPallas(input_size, 1, hidden_size, output_size, key=k_p1)
    xl = jax.random.normal(k_x, (B, 40), dtype=jnp.float32)
    out1 = jax.block_until_ready(policy1(xl))
    ref1 = _reference_forward(policy1, xl)
    assert jnp.allclose(out1, ref1, atol=2e-3, rtol=2e-3)

    # Whole CCEA population in ONE pallas_call (review's structural win):
    # 16 policies x 32 observations each.
    P, Bp = 16, 32
    pop = MLPPolicyPallas(input_size, hidden_layers, hidden_size, output_size,
                          key=k_pop, pop_size=P)
    xp = jax.random.normal(k_xp, (P, Bp, 20), dtype=jnp.float32)
    outp = jax.block_until_ready(pop(xp))
    assert outp.shape == (P, Bp, output_size), outp.shape
    refp = _reference_forward(pop, xp)
    assert jnp.allclose(outp, refp, atol=2e-3, rtol=2e-3)

    print("KERNEL_OK")
</pallas_src>

<mosaic_0001>
module attributes {stable_mosaic.version = 11 : i64} {
  func.func @kernel(%arg0: i32, %arg1: i32, %arg2: memref<1x1x20xf32, #tpu.memory_space<vmem>>, %arg3: memref<1x32x128xbf16, #tpu.memory_space<vmem>>, %arg4: memref<1x1x128xf32, #tpu.memory_space<vmem>>, %arg5: memref<1x128x128xbf16, #tpu.memory_space<vmem>>, %arg6: memref<1x1x128xf32, #tpu.memory_space<vmem>>, %arg7: memref<1x128x128xbf16, #tpu.memory_space<vmem>>, %arg8: memref<1x1x128xf32, #tpu.memory_space<vmem>>, %arg9: memref<1x1x128xf32, #tpu.memory_space<vmem>>) attributes {dimension_semantics = [#tpu.dimension_semantics<parallel>, #tpu.dimension_semantics<parallel>], iteration_bounds = array<i64: 1, 1>, scalar_prefetch = 0 : i64, scratch_operands = 0 : i64, tpu.core_type = #tpu.core_type<tc>, window_params = [{transform_indices = @transform_0, window_bounds = array<i64: 1, 1, 20>}, {transform_indices = @transform_1, window_bounds = array<i64: 1, 32, 128>}, {transform_indices = @transform_2, window_bounds = array<i64: 1, 1, 128>}, {transform_indices = @transform_3, window_bounds = array<i64: 1, 128, 128>}, {transform_indices = @transform_4, window_bounds = array<i64: 1, 1, 128>}, {transform_indices = @transform_5, window_bounds = array<i64: 1, 128, 128>}, {transform_indices = @transform_6, window_bounds = array<i64: 1, 1, 128>}, {transform_indices = @transform_7, window_bounds = array<i64: 1, 1, 128>}]} {
    %c0 = arith.constant 0 : index
    %c0_0 = arith.constant 0 : index
    %c0_1 = arith.constant 0 : index
    %0 = vector.load %arg2[%c0, %c0_0, %c0_1] : memref<1x1x20xf32, #tpu.memory_space<vmem>>, vector<1x1x20xf32>
    %1 = vector.shape_cast %0 : vector<1x1x20xf32> to vector<1x20xf32>
    %cst = arith.constant 0.000000e+00 : f32
    %2 = vector.broadcast %cst : f32 to vector<1x12xf32>
    %3 = tpu.concatenate %1, %2 in 1 : vector<1x20xf32>, vector<1x12xf32> -> vector<1x32xf32>
    %4 = arith.truncf %3 : vector<1x32xf32> to vector<1x32xbf16>
    %c0_2 = arith.constant 0 : index
    %c0_3 = arith.constant 0 : index
    %c0_4 = arith.constant 0 : index
    %5 = vector.load %arg3[%c0_2, %c0_3, %c0_4] : memref<1x32x128xbf16, #tpu.memory_space<vmem>>, vector<1x32x128xbf16>
    %6 = vector.shape_cast %5 : vector<1x32x128xbf16> to vector<32x128xbf16>
    %cst_5 = arith.constant dense<0.000000e+00> : vector<1x128xf32>
    %7 = tpu.matmul %4, %6, %cst_5 {dimension_numbers = #tpu.dot_dimension_numbers<[1], [0], [0], [1], [0, 0, 1, 1], [], []>} : vector<1x32xbf16>, vector<32x128xbf16>, vector<1x128xf32> -> vector<1x128xf32>
    %c0_6 = arith.constant 0 : index
    %c0_7 = arith.constant 0 : index
    %c0_8 = arith.constant 0 : index
    %8 = vector.load %arg4[%c0_6, %c0_7, %c0_8] : memref<1x1x128xf32, #tpu.memory_space<vmem>>, vector<1x1x128xf32>
    %9 = vector.shape_cast %8 : vector<1x1x128xf32> to vector<1x128xf32>
    %10 = arith.addf %7, %9 : vector<1x128xf32>
    %cst_9 = arith.constant 0.000000e+00 : f32
    %11 = vector.broadcast %cst_9 : f32 to vector<1x128xf32>
    %12 = arith.cmpf ogt, %10, %11 : vector<1x128xf32>
    %cst_10 = arith.constant 0.00999999977 : f32
    %13 = vector.broadcast %cst_10 : f32 to vector<1x128xf32>
    %14 = arith.mulf %13, %10 : vector<1x128xf32>
    %15 = arith.select %12, %10, %14 : vector<1x128xi1>, vector<1x128xf32>
    %16 = arith.truncf %15 : vector<1x128xf32> to vector<1x128xbf16>
    %c0_11 = arith.constant 0 : index
    %c0_12 = arith.constant 0 : index
    %c0_13 = arith.constant 0 : index
    %17 = vector.load %arg5[%c0_11, %c0_12, %c0_13] : memref<1x128x128xbf16, #tpu.memory_space<vmem>>, vector<1x128x128xbf16>
    %18 = vector.shape_cast %17 : vector<1x128x128xbf16> to vector<128x128xbf16>
    %cst_14 = arith.constant dense<0.000000e+00> : vector<1x128xf32>
    %19 = tpu.matmul %16, %18, %cst_14 {dimension_numbers = #tpu.dot_dimension_numbers<[1], [0], [0], [1], [0, 0, 1, 1], [], []>} : vector<1x128xbf16>, vector<128x128xbf16>, vector<1x128xf32> -> vector<1x128xf32>
    %c0_15 = arith.constant 0 : index
    %c0_16 = arith.constant 0 : index
    %c0_17 = arith.constant 0 : index
    %20 = vector.load %arg6[%c0_15, %c0_16, %c0_17] : memref<1x1x128xf32, #tpu.memory_space<vmem>>, vector<1x1x128xf32>
    %21 = vector.shape_cast %20 : vector<1x1x128xf32> to vector<1x128xf32>
    %22 = arith.addf %19, %21 : vector<1x128xf32>
    %cst_18 = arith.constant 0.000000e+00 : f32
    %23 = vector.broadcast %cst_18 : f32 to vector<1x128xf32>
    %24 = arith.cmpf ogt, %22, %23 : vector<1x128xf32>
    %cst_19 = arith.constant 0.00999999977 : f32
    %25 = vector.broadcast %cst_19 : f32 to vector<1x128xf32>
    %26 = arith.mulf %25, %22 : vector<1x128xf32>
    %27 = arith.select %24, %22, %26 : vector<1x128xi1>, vector<1x128xf32>
    %28 = arith.truncf %27 : vector<1x128xf32> to vector<1x128xbf16>
    %c0_20 = arith.constant 0 : index
    %c0_21 = arith.constant 0 : index
    %c0_22 = arith.constant 0 : index
    %29 = vector.load %arg7[%c0_20, %c0_21, %c0_22] : memref<1x128x128xbf16, #tpu.memory_space<vmem>>, vector<1x128x128xbf16>
    %30 = vector.shape_cast %29 : vector<1x128x128xbf16> to vector<128x128xbf16>
    %cst_23 = arith.constant dense<0.000000e+00> : vector<1x128xf32>
    %31 = tpu.matmul %28, %30, %cst_23 {dimension_numbers = #tpu.dot_dimension_numbers<[1], [0], [0], [1], [0, 0, 1, 1], [], []>} : vector<1x128xbf16>, vector<128x128xbf16>, vector<1x128xf32> -> vector<1x128xf32>
    %c0_24 = arith.constant 0 : index
    %c0_25 = arith.constant 0 : index
    %c0_26 = arith.constant 0 : index
    %32 = vector.load %arg8[%c0_24, %c0_25, %c0_26] : memref<1x1x128xf32, #tpu.memory_space<vmem>>, vector<1x1x128xf32>
    %33 = vector.shape_cast %32 : vector<1x1x128xf32> to vector<1x128xf32>
    %34 = arith.addf %31, %33 : vector<1x128xf32>
    %cst_27 = arith.constant 0.000000e+00 : f32
    %35 = vector.broadcast %cst_27 : f32 to vector<1x128xf32>
    %36 = arith.subf %35, %34 : vector<1x128xf32>
    %37 = math.exp %36 : vector<1x128xf32>
    %cst_28 = arith.constant 1.000000e+00 : f32
    %38 = vector.broadcast %cst_28 : f32 to vector<1x128xf32>
    %39 = arith.addf %38, %37 : vector<1x128xf32>
    %cst_29 = arith.constant 1.000000e+00 : f32
    %40 = vector.broadcast %cst_29 : f32 to vector<1x128xf32>
    %41 = arith.divf %40, %39 : vector<1x128xf32>
    %c0_30 = arith.constant 0 : index
    %c0_31 = arith.constant 0 : index
    %c0_32 = arith.constant 0 : index
    %42 = vector.load %arg9[%c0_30, %c0_31, %c0_32] : memref<1x1x128xf32, #tpu.memory_space<vmem>>, vector<1x1x128xf32>
    %43 = vector.shape_cast %42 : vector<1x1x128xf32> to vector<1x128xf32>
    %44 = vector.shape_cast %41 : vector<1x128xf32> to vector<1x1x128xf32>
    tpu.vector_store %arg9[%c0_30, %c0_31, %c0_32], %44 {strides = array<i32>} : memref<1x1x128xf32, #tpu.memory_space<vmem>>, vector<1x1x128xf32>,
    return
  }
  func.func @transform_0(%arg0: i32, %arg1: i32) -> (i32, i32, i32) {
    %c0_i32 = arith.constant 0 : i32
    %c0_i32_0 = arith.constant 0 : i32
    return %arg0, %arg1, %c0_i32 : i32, i32, i32
  }
  func.func @transform_1(%arg0: i32, %arg1: i32) -> (i32, i32, i32) {
    %c0_i32 = arith.constant 0 : i32
    %c0_i32_0 = arith.constant 0 : i32
    %c0_i32_1 = arith.constant 0 : i32
    return %arg0, %c0_i32, %c0_i32_0 : i32, i32, i32
  }
  func.func @transform_2(%arg0: i32, %arg1: i32) -> (i32, i32, i32) {
    %c0_i32 = arith.constant 0 : i32
    %c0_i32_0 = arith.constant 0 : i32
    %c0_i32_1 = arith.constant 0 : i32
    return %arg0, %c0_i32, %c0_i32_0 : i32, i32, i32
  }
  func.func @transform_3(%arg0: i32, %arg1: i32) -> (i32, i32, i32) {
    %c0_i32 = arith.constant 0 : i32
    %c0_i32_0 = arith.constant 0 : i32
    %c0_i32_1 = arith.constant 0 : i32
    return %arg0, %c0_i32, %c0_i32_0 : i32, i32, i32
  }
  func.func @transform_4(%arg0: i32, %arg1: i32) -> (i32, i32, i32) {
    %c0_i32 = arith.constant 0 : i32
    %c0_i32_0 = arith.constant 0 : i32
    %c0_i32_1 = arith.constant 0 : i32
    return %arg0, %c0_i32, %c0_i32_0 : i32, i32, i32
  }
  func.func @transform_5(%arg0: i32, %arg1: i32) -> (i32, i32, i32) {
    %c0_i32 = arith.constant 0 : i32
    %c0_i32_0 = arith.constant 0 : i32
    %c0_i32_1 = arith.constant 0 : i32
    return %arg0, %c0_i32, %c0_i32_0 : i32, i32, i32
  }
  func.func @transform_6(%arg0: i32, %arg1: i32) -> (i32, i32, i32) {
    %c0_i32 = arith.constant 0 : i32
    %c0_i32_0 = arith.constant 0 : i32
    %c0_i32_1 = arith.constant 0 : i32
    return %arg0, %c0_i32, %c0_i32_0 : i32, i32, i32
  }
  func.func @transform_7(%arg0: i32, %arg1: i32) -> (i32, i32, i32) {
    %c0_i32 = arith.constant 0 : i32
    %c0_i32_0 = arith.constant 0 : i32
    return %arg0, %arg1, %c0_i32 : i32, i32, i32
  }
}

</mosaic_0001>

<bundles_post_ra>
// kernel: _forward_impl.1
= control target key start
LH: loop header
LB: loop body
LE: loop exit
PB: predicated region body
PF: predicated region fallthrough
CT: control target
= control target key end

     0   :  { %12 = vsyncpa [#allocation3], 0  ;;  %s721_s0 = inlined_call_operand.hbm [shape: f32[1,1,20], index: 0, kind: input, shape index: {}]   ;;  %s722_s1 = inlined_call_operand.hbm [shape: bf16[1,32,128], index: 1, kind: input, shape index: {}]   ;;  %s723_s2 = inlined_call_operand.vmem [shape: f32[1,1,128], index: 2, kind: input, shape index: {}]   ;;  %s724_s3 = inlined_call_operand.hbm [shape: bf16[1,128,128], index: 3, kind: input, shape index: {}]   ;;  %s725_s4 = inlined_call_operand.vmem [shape: f32[1,1,128], index: 4, kind: input, shape index: {}]   ;;  %s726_s5 = inlined_call_operand.hbm [shape: bf16[1,128,128], index: 5, kind: input, shape index: {}]   ;;  %s727_s6 = inlined_call_operand.vmem [shape: f32[1,1,128], index: 6, kind: input, shape index: {}]   ;;  %s728_s7 = inlined_call_operand.hbm [shape: f32[1,1,128], index: 7, kind: output, shape index: {}]  }
   0x1   :  { %13 = vsyncpa [#allocation6], 0 }
   0x2   :  { %14 = vsyncpa [#allocation9], 0 }
   0x3   :  { %15 = vsyncpa [#allocation4], 0  ;;  %s615_s24 = smov [#allocation5]  }
   0x4   :  { %s31_s25 = sshll.u32 %s615_s24, 4  ;;  %s32_s25 = int_to_ptr.vmem [resolvable:$true] %s31_s25 }
   0x5   :  { %s515_s26 = scalar_lea.vmem %s32_s25, 256  ;;  %p520_p1 = scmp.lt.s32.totalorder %s32_s25, %s32_s25 }
   0x6   :  { %p516_p0 = scmp.ne.s32.totalorder %s32_s25, %s515_s26  ;;  %p521_p2 = scmp.lt.s32.totalorder %s515_s26, %s515_s26 }
   0x8   :  { %p522_p3 = por %p521_p2, %p520_p1 }
   0xa   :  { %p523_p4 = pnand %p522_p3, %p516_p0 }
   0xc   :  { %526 = shalt.err (!%p523_p4)
}
   0xd   :  { %s616_s27 = smov 64   ;;  %s617_s28 = smov 4  }
   0xe   :  { %37 = dma.hbm_to_vmem [thread:$0]  %s722_s1, 256, %s32_s25, [#allocation6], %s616_s27, %s616_s27, %s617_s28  }
   0xf   :  { %s618_s8 = smov [#allocation2]   ;;  %s619_s10 = smov [#allocation7]  }
  0x10   :  { %s22_s9 = sshll.u32 %s618_s8, 4  ;;  %s45_s11 = sshll.u32 %s619_s10, 4  ;;  %s23_s9 = int_to_ptr.vmem [resolvable:$true] %s22_s9  ;;  %s46_s11 = int_to_ptr.vmem [resolvable:$true] %s45_s11 }
  0x11   :  { %s535_s12 = scalar_lea.vmem %s23_s9, 16  ;;  %s539_s13 = scalar_lea.vmem %s23_s9, 32 }
  0x12   :  { %p536_p5 = scmp.ne.s32.totalorder %s23_s9, %s535_s12  ;;  %p540_p6 = scmp.lt.s32.totalorder %s23_s9, %s23_s9 }
  0x13   :  { %p541_p7 = scmp.lt.s32.totalorder %s539_s13, %s535_s12 }
  0x15   :  { %p542_p8 = por %p541_p7, %p540_p6 }
  0x17   :  { %p543_p9 = pnand %p542_p8, %p536_p5 }
  0x19   :  { %546 = shalt.err (!%p543_p9)
}
  0x1a   :  { %25 = dma.hbm_to_vmem [thread:$0]  %s721_s0, 16, %s23_s9, [#allocation3]  }
  0x1b   :  { %s555_s16 = scalar_lea.vmem %s46_s11, 1024  ;;  %p560_p11 = scmp.lt.s32.totalorder %s46_s11, %s46_s11 }
  0x1c   :  { %p556_p10 = scmp.ne.s32.totalorder %s46_s11, %s555_s16  ;;  %p561_p12 = scmp.lt.s32.totalorder %s555_s16, %s555_s16 }
  0x1e   :  { %p562_p13 = por %p561_p12, %p560_p11 }
  0x20   :  { %p563_p0 = pnand %p562_p13, %p556_p10 }
  0x22   :  { %566 = shalt.err (!%p563_p0)
}
  0x23   :  { %51 = dma.hbm_to_vmem [thread:$0]  %s724_s3, 1024, %s46_s11, [#allocation6], %s616_s27, %s616_s27, %s617_s28  }
  0x24   :  { %s620_s18 = smov [#allocation8]  }
  0x25   :  { %s59_s19 = sshll.u32 %s620_s18, 4  ;;  %s60_s19 = int_to_ptr.vmem [resolvable:$true] %s59_s19 }
  0x26   :  { %s575_s20 = scalar_lea.vmem %s60_s19, 1024  ;;  %p580_p2 = scmp.lt.s32.totalorder %s60_s19, %s60_s19 }
  0x27   :  { %p576_p1 = scmp.ne.s32.totalorder %s60_s19, %s575_s20  ;;  %p581_p3 = scmp.lt.s32.totalorder %s575_s20, %s575_s20 }
  0x29   :  { %p582_p4 = por %p581_p3, %p580_p2 }
  0x2b   :  { %p583_p5 = pnand %p582_p4, %p576_p1 }
  0x2d   :  { %586 = shalt.err (!%p583_p5)
}
  0x2e   :  { %65 = dma.hbm_to_vmem [thread:$0]  %s726_s5, 1024, %s60_s19, [#allocation9], %s616_s27, %s616_s27, %s617_s28  }
  0x2f   :  { %607 = dma.done.wait [#allocation3], 16  }
  0x30   :  { %608 = vsyncadd [#allocation3], 4294967280 }
  0x31   :  { %609 = dma.done.wait [#allocation6], 1280  }
  0x32   :  { %610 = vsyncadd [#allocation6], 4294966016 }
  0x33   :  { %611 = dma.done.wait [#allocation9], 1024  }
  0x34   :  { %612 = vsyncadd [#allocation9], 4294966272  ;;  %v621_v0 = vmov 0.0   ;;  %vm622_vm0 = vmmov 0   ;;  %v485_v1 = vld [vmem:[#allocation5 + $0x8] sm:$0xff]   ;;  %vm82_vm1 = vcmask 162816  }
  0x35   :  { %428 = vmatprep.subr.bf16.mxu0 %v621_v0  ;;  %432 = vmatprep.mubr.msk.bf16.mxu0 %vm622_vm0, %v621_v0  ;;  %v486_v2 = vld [vmem:[#allocation5] sm:$0xff]   ;;  %v81_v3 = vld [vmem:[#allocation2] sm:$0x1]  ;;  %v487_v5 = vld [vmem:[#allocation7 + $0x38] sm:$0xff]   ;;  %vm102_vm2 = vcmask 261120  }
  0x36   :  { %436 = vmatprep.subr.bf16.mxu1 %v621_v0  ;;  %452 = vmatprep.mubr.msk.bf16.mxu1 %vm622_vm0, %v621_v0  ;;  %v83_v4 = vsel %vm82_vm1, %v81_v3, 0.0  ;;  %v488_v7 = vld [vmem:[#allocation7 + $0x30] sm:$0xff]   ;;  %v489_v8 = vld [vmem:[#allocation7 + $0x28] sm:$0xff]   ;;  %v490_v9 = vld [vmem:[#allocation7 + $0x20] sm:$0xff]  }
  0x37   :  { %429 = vmatpush3.bf16.msra.mxu0 %v485_v1  ;;  %v84_v6 = vpack.c.bf16 %v83_v4, %v83_v4  ;;  %437 = vmatpush3.bf16.msra.mxu1 %v487_v5  ;;  %v491_v10 = vld [vmem:[#allocation7 + $0x18] sm:$0xff]   ;;  %v492_v11 = vld [vmem:[#allocation7 + $0x10] sm:$0xff]   ;;  %v493_v12 = vld [vmem:[#allocation7 + $0x8] sm:$0xff]  }
  0x38   :  { %430 = vmatprep.subr.bf16.mxu0 %v621_v0  ;;  %438 = vmatprep.subr.bf16.mxu1 %v621_v0  ;;  %v494_v13 = vld [vmem:[#allocation7] sm:$0xff]   ;;  %v495_v14 = vld [vmem:[#allocation8 + $0x38] sm:$0xff]   ;;  %v496_v15 = vld [vmem:[#allocation8 + $0x30] sm:$0xff]  }
  0x39   :  { %v497_v16 = vld [vmem:[#allocation8 + $0x28] sm:$0xff]   ;;  %v498_v17 = vld [vmem:[#allocation8 + $0x20] sm:$0xff]   ;;  %v499_v18 = vld [vmem:[#allocation8 + $0x18] sm:$0xff]  }
  0x3a   :  { %v500_v19 = vld [vmem:[#allocation8 + $0x10] sm:$0xff]   ;;  %v89_v20 = vld [vmem:[%s723_s2] sm:$0x1]  ;;  %v502_v30 = vld [vmem:[#allocation8] sm:$0xff]  }
  0x3b   :  { %431 = vmatpush3.bf16.msra.mxu0 %v486_v2  ;;  %439 = vmatpush3.bf16.msra.mxu1 %v488_v7  ;;  %v501_v29 = vld [vmem:[#allocation8 + $0x8] sm:$0xff]  }
  0x3c   :  { %456 = vmatprep.subr.bf16.mxu0 %v621_v0  ;;  %440 = vmatprep.subr.bf16.mxu1 %v621_v0  ;;  %v166_v31 = vld [vmem:[%s725_s4] sm:$0x1]  ;;  %s623_s4 = smov [#allocation10]  }
  0x3d   :  { %v275_v40 = vld [vmem:[%s727_s6] sm:$0x1]  ;;  %s377_s25 = sshll.u32 %s623_s4, 4  ;;  %s378_s25 = int_to_ptr.vmem [resolvable:$true] %s377_s25 }
  0x3e   :  { %433 = vmatmul.mubr.msk.bf16.vlgmr.msra.gmra.mxu0 %vm102_vm2, %v84_v6  ;;  %s587_s26 = scalar_lea.vmem %s378_s25, 16  ;;  %s591_s27 = scalar_lea.vmem %s378_s25, 32 }
  0x3f   :  { %472 = vmatprep.mubr.msk.bf16.mxu0 %vm622_vm0, %v621_v0  ;;  %441 = vmatpush3.bf16.msra.mxu1 %v489_v8  ;;  %p588_p6 = scmp.ne.s32.totalorder %s378_s25, %s587_s26  ;;  %p592_p7 = scmp.lt.s32.totalorder %s378_s25, %s378_s25 }
  0x40   :  { %442 = vmatprep.subr.bf16.mxu1 %v621_v0  ;;  %457 = vmatpush3.bf16.msra.mxu0 %v495_v14  ;;  %p593_p8 = scmp.lt.s32.totalorder %s591_s27, %s587_s26 }
  0x41   :  { %458 = vmatprep.subr.bf16.mxu0 %v621_v0 }
  0x42   :  { %p594_p9 = por %p593_p8, %p592_p7 }
  0x43   :  { %443 = vmatpush3.bf16.msra.mxu1 %v490_v9 }
  0x44   :  { %444 = vmatprep.subr.bf16.mxu1 %v621_v0  ;;  %459 = vmatpush3.bf16.msra.mxu0 %v496_v15  ;;  %p595_p10 = pnand %p594_p9, %p588_p6 }
  0x45   :  { %460 = vmatprep.subr.bf16.mxu0 %v621_v0 }
  0x47   :  { %445 = vmatpush3.bf16.msra.mxu1 %v491_v10 }
  0x48   :  { %446 = vmatprep.subr.bf16.mxu1 %v621_v0  ;;  %461 = vmatpush3.bf16.msra.mxu0 %v497_v16 }
  0x49   :  { %462 = vmatprep.subr.bf16.mxu0 %v621_v0 }
  0x4b   :  { %447 = vmatpush3.bf16.msra.mxu1 %v492_v11 }
  0x4c   :  { %448 = vmatprep.subr.bf16.mxu1 %v621_v0  ;;  %463 = vmatpush3.bf16.msra.mxu0 %v498_v17 }
  0x4d   :  { %464 = vmatprep.subr.bf16.mxu0 %v621_v0 }
  0x4f   :  { %449 = vmatpush3.bf16.msra.mxu1 %v493_v12 }
  0x50   :  { %450 = vmatprep.subr.bf16.mxu1 %v621_v0  ;;  %465 = vmatpush3.bf16.msra.mxu0 %v499_v18 }
  0x51   :  { %466 = vmatprep.subr.bf16.mxu0 %v621_v0 }
  0x53   :  { %451 = vmatpush3.bf16.msra.mxu1 %v494_v13 }
  0x54   :  { %467 = vmatpush3.bf16.msra.mxu0 %v500_v19 }
  0x55   :  { %468 = vmatprep.subr.bf16.mxu0 %v621_v0 }
  0x58   :  { %469 = vmatpush3.bf16.msra.mxu0 %v501_v29 }
  0x59   :  { %470 = vmatprep.subr.bf16.mxu0 %v621_v0 }
  0x5c   :  { %471 = vmatpush3.bf16.msra.mxu0 %v502_v30 }
  0xfe   :  { %v140_v21 = vpop.f32.mrf.mxu0 }
  0xff   :  { %v141_v22 = vadd.f32 %v140_v21, %v89_v20 }
 0x100   :  { %v434_v23 = vpop.f32.mrf.mxu0 }
 0x101   :  { %vm146_vm3 = vcmp.gt.f32.partialorder %v141_v22, 0.0  ;;  %v147_v24 = vmul.f32 0.01, %v141_v22 }
 0x102   :  { %v143_v25 = vpop.f32.mrf.mxu0 }
 0x103   :  { %v148_v26 = vsel %vm146_vm3, %v141_v22, %v147_v24 }
 0x104   :  { %v435_v27 = vpop.f32.mrf.mxu0  ;;  %v149_v28 = vpack.c.bf16 %v148_v26, %v148_v26 }
 0x106   :  { %453 = vmatmul.mubr.bf16.vlgmr.msra.gmra.mxu1 %v149_v28 }
 0x1c6   :  { %v249_v32 = vpop.f32.mrf.mxu1 }
 0x1c7   :  { %v250_v33 = vadd.f32 %v249_v32, %v166_v31 }
 0x1c8   :  { %v454_v34 = vpop.f32.mrf.mxu1 }
 0x1c9   :  { %vm255_vm4 = vcmp.gt.f32.partialorder %v250_v33, 0.0  ;;  %v256_v35 = vmul.f32 0.01, %v250_v33 }
 0x1ca   :  { %v252_v36 = vpop.f32.mrf.mxu1 }
 0x1cb   :  { %v257_v37 = vsel %vm255_vm4, %v250_v33, %v256_v35 }
 0x1cc   :  { %v258_v38 = vpack.c.bf16 %v257_v37, %v257_v37  ;;  %v455_v39 = vpop.f32.mrf.mxu1 }
 0x1ce   :  { %473 = vmatmul.mubr.bf16.vlgmr.msra.gmra.mxu0 %v258_v38 }
 0x28e   :  { %v358_v41 = vpop.f32.mrf.mxu0 }
 0x28f   :  { %v359_v42 = vadd.f32 %v358_v41, %v275_v40 }
 0x290   :  { %v474_v43 = vpop.f32.mrf.mxu0 }
 0x291   :  { %v364_v44 = vsub.f32 0.0, %v359_v42 }
 0x292   :  { %v361_v45 = vpop.f32.mrf.mxu0 }
 0x293   :  { %v365_v46 = vmul.f32 1.442695, %v364_v44 }
 0x294   :  { %v475_v47 = vpop.f32.mrf.mxu0 }
 0x295   :  { %503 = vpow2.f32 %v365_v46 }
 0x2a2   :  { %v504_v48 = vpop.eup %503 }
 0x2a3   :  { %v367_v49 = vadd.f32 1.0, %v504_v48 }
 0x2a5   :  { %505 = vrcp.f32 %v367_v49 }
 0x2b2   :  { %v506_v50 = vpop.eup %505 }
 0x2b3   :  { %370 = vst [vmem:[#allocation10] sm:$0x1] %v506_v50 }
 0x2b4   :  { %598 = shalt.err (!%p595_p10)
}
 0x2b5   :  { %380 = dma.vmem_to_hbm [thread:$0]  %s378_s25, 16, %s728_s7, [#allocation4]  }
 0x2b6   :  { %613 = dma.done.wait [#allocation4], 16  }
 0x2b7   :  { %614 = vsyncadd [#allocation4], 4294967280 }
 0x2b8   :  { %384 = vsyncpa [#allocation3], 1 }
 0x2b9   :  { %385 = vsyncpa [#allocation6], 1 }
 0x2ba   :  { %386 = vsyncpa [#allocation9], 1 }
 0x2bb   :  { %387 = vsyncpa [#allocation4], 1 }

</bundles_post_ra>
